<compile_context>
chip_gen: v6e
topology: v6e:2x2x1
jax: 0.10.0
libtpu: 0.0.40
codegen_flags: <defaults>
</compile_context>

<pallas_src>
import functools
import math

import jax
import jax.numpy as jnp
from jax.experimental import pallas as pl
from jax.experimental.pallas import tpu as pltpu

_LANE = 128
# ~2 MiB per input/output stream: 3 streams x 2 buffers x 2 MiB = 12 MiB,
# comfortably under the v5e 16 MiB default scoped-VMEM limit (v6e/v7x: 32 MiB),
# while already recovering ~all of the HBM roofline for an elementwise op.
_TARGET_BLOCK_BYTES = 2 * 1024 * 1024
# Below this many output elements, launch + layout plumbing dominates; let
# XLA's fused elementwise op handle it.
_SMALL_SIZE_THRESHOLD = 128 * 1024


def _round_up(v, m):
    return (v + m - 1) // m * m


def _round_down(v, m):
    return (v // m) * m


def _sublane_pack(itemsize):
    # Sub-32-bit dtypes pack along sublanes.
    return {4: 8, 2: 16, 1: 32}.get(itemsize, 8)


def _binary_kernel(x_ref, y_ref, o_ref, *, op, alpha, out_dtype):
    # Cast + broadcast happen here on the VPU (free vs. an HBM round-trip).
    x = x_ref[...].astype(out_dtype)
    y = y_ref[...].astype(out_dtype)
    if alpha != 1:
        y = y * jnp.asarray(alpha, dtype=out_dtype)
    if op == "add":
        o_ref[...] = x + y
    elif op == "sub":
        o_ref[...] = x - y
    elif op == "mul":
        o_ref[...] = x * y
    else:
        raise ValueError(f"unsupported op: {op}")


def _flat_elementwise(x, y, op, alpha, out_dtype, out_shape):
    """Same-shape path: flat lane-dense (rows, 128) layout, 1-D parallel grid."""
    total = int(math.prod(out_shape)) if out_shape else 1
    itemsizes = [jnp.dtype(d).itemsize for d in (x.dtype, y.dtype, out_dtype)]
    # Narrowest dtype has the largest sublane pack; using it makes tile_r a
    # valid multiple for every stream.
    sublane = _sublane_pack(min(itemsizes))
    max_itemsize = max(itemsizes)

    rows_raw = pl.cdiv(total, _LANE)
    rows = _round_up(rows_raw, sublane)          # pad only to the sublane pack

    tile_r = _round_down(_TARGET_BLOCK_BYTES // (_LANE * max_itemsize), sublane)
    tile_r = max(tile_r, sublane)
    tile_r = min(tile_r, rows)
    # v7x: ensure >= 2 blocks on the "parallel" axis whenever splittable so both
    # TensorCores get work; harmless on v5e/v6e.
    if rows > sublane and pl.cdiv(rows, tile_r) < 2:
        tile_r = _round_up(pl.cdiv(rows, 2), sublane)
    grid = (pl.cdiv(rows, tile_r),)              # ragged last block handled by Pallas

    pad = rows * _LANE - total
    x1 = x.reshape(-1)
    y1 = y.reshape(-1)
    if pad:
        x1 = jnp.pad(x1, (0, pad))
        y1 = jnp.pad(y1, (0, pad))
    x2 = x1.reshape(rows, _LANE)
    y2 = y1.reshape(rows, _LANE)

    kernel = functools.partial(_binary_kernel, op=op, alpha=alpha, out_dtype=out_dtype)
    out2 = pl.pallas_call(
        kernel,
        out_shape=jax.ShapeDtypeStruct((rows, _LANE), out_dtype),
        grid_spec=pltpu.PrefetchScalarGridSpec(
            num_scalar_prefetch=0,
            grid=grid,
            in_specs=[
                pl.BlockSpec((tile_r, _LANE), lambda i: (i, 0)),
                pl.BlockSpec((tile_r, _LANE), lambda i: (i, 0)),
            ],
            out_specs=pl.BlockSpec((tile_r, _LANE), lambda i: (i, 0)),
        ),
        compiler_params=pltpu.CompilerParams(
            dimension_semantics=("parallel",),
        ),
    )(x2, y2)

    out1 = out2.reshape(-1)
    if pad:
        out1 = out1[:total]
    return out1.reshape(out_shape)


def _broadcast_elementwise(x, y, op, alpha, out_dtype, out_shape):
    """Broadcast path: per-operand BlockSpecs; broadcast/cast done in-kernel."""
    rank = max(len(out_shape), 2)
    oshape = (1,) * (rank - len(out_shape)) + tuple(out_shape)
    xshape = (1,) * (rank - x.ndim) + tuple(x.shape)
    yshape = (1,) * (rank - y.ndim) + tuple(y.shape)

    lead = oshape[:-2]
    last2 = oshape[-2:]

    # VMEM fit check for the full-trailing-two-dims blocks; if too large,
    # materialize the broadcast once and use the lane-dense flat path instead.
    def _block_bytes(shape, dtype):
        return int(math.prod(shape[-2:])) * jnp.dtype(dtype).itemsize

    est = 2 * (_block_bytes(xshape, x.dtype) + _block_bytes(yshape, y.dtype)
               + _block_bytes(oshape, out_dtype))
    if est > 8 * 1024 * 1024:
        xb = jnp.broadcast_to(x.reshape(xshape), oshape)
        yb = jnp.broadcast_to(y.reshape(yshape), oshape)
        return _flat_elementwise(xb, yb, op, alpha, out_dtype, out_shape)

    xr = x.reshape(xshape)
    yr = y.reshape(yshape)

    def operand_spec(shape):
        block = (1,) * len(lead) + tuple(shape[-2:])
        bcast = tuple(s == 1 for s in shape[:-2])

        def index_map(*idx):
            lead_idx = tuple(0 if b else i for b, i in zip(bcast, idx))
            return lead_idx + (0, 0)

        return pl.BlockSpec(block, index_map)

    out_block = (1,) * len(lead) + tuple(last2)

    def out_index_map(*idx):
        return tuple(idx[: len(lead)]) + (0, 0)

    grid = tuple(lead) if lead else (1,)

    kernel = functools.partial(_binary_kernel, op=op, alpha=alpha, out_dtype=out_dtype)
    out = pl.pallas_call(
        kernel,
        out_shape=jax.ShapeDtypeStruct(oshape, out_dtype),
        grid_spec=pltpu.PrefetchScalarGridSpec(
            num_scalar_prefetch=0,
            grid=grid,
            in_specs=[operand_spec(xshape), operand_spec(yshape)],
            out_specs=pl.BlockSpec(out_block, out_index_map),
        ),
        compiler_params=pltpu.CompilerParams(
            dimension_semantics=("parallel",) * len(grid),
        ),
    )(xr, yr)
    return out.reshape(out_shape)


def _jnp_binary(x, y, op, alpha, out_dtype):
    xo = x.astype(out_dtype)
    yo = y.astype(out_dtype)
    if alpha != 1:
        yo = yo * jnp.asarray(alpha, dtype=out_dtype)
    if op == "add":
        return xo + yo
    if op == "sub":
        return xo - yo
    return xo * yo


def binary_op_pallas(x, y, op="add", alpha=1, *, force_pallas=False):
    """Elementwise binary op with torch.add/sub/mul semantics (broadcast, alpha)."""
    x = jnp.asarray(x)
    y = jnp.asarray(y)
    if op not in ("add", "sub", "mul"):
        raise ValueError(f"unsupported op: {op}")
    if op == "mul" and alpha != 1:
        raise ValueError("torch.mul has no 'alpha' argument")

    out_shape = jnp.broadcast_shapes(x.shape, y.shape)
    out_dtype = jnp.result_type(x.dtype, y.dtype)
    if alpha != 1 and jnp.issubdtype(out_dtype, jnp.integer) and float(alpha) != int(alpha):
        raise ValueError("fractional alpha with integer output (torch raises too)")

    total = int(math.prod(out_shape)) if out_shape else 1
    if total == 0:
        return jnp.zeros(out_shape, out_dtype)

    # Small-input bypass: launch + layout plumbing would dominate.
    if not force_pallas and total < _SMALL_SIZE_THRESHOLD:
        return _jnp_binary(x, y, op, alpha, out_dtype)

    same_shape = tuple(x.shape) == tuple(out_shape) and tuple(y.shape) == tuple(out_shape)
    if same_shape:
        return _flat_elementwise(x, y, op, alpha, out_dtype, out_shape)
    return _broadcast_elementwise(x, y, op, alpha, out_dtype, out_shape)


if __name__ == "__main__":
    key = jax.random.PRNGKey(0)
    kx, ky, kz, kw = jax.random.split(key, 4)

    # Primary test shape from the operation-test model (small NCHW tensors).
    shape = (2, 4, 16, 16)
    x = jax.random.normal(kx, shape, dtype=jnp.float32)
    y = jax.random.normal(ky, shape, dtype=jnp.float32)

    # Force the Pallas path for the primary shape (default would bypass to XLA
    # for an input this small, per the perf review).
    out = binary_op_pallas(x, y, op="add", force_pallas=True)
    jax.block_until_ready(out)
    assert out.shape == shape
    assert jnp.allclose(out, x + y, atol=1e-6, rtol=1e-6)

    # Small-input bypass path (default behaviour).
    out_bypass = binary_op_pallas(x, y, op="add")
    assert jnp.allclose(out_bypass, x + y, atol=1e-6, rtol=1e-6)

    # torch.add alpha semantics, sub, mul.
    out_a = binary_op_pallas(x, y, op="add", alpha=2.5, force_pallas=True)
    assert jnp.allclose(out_a, x + 2.5 * y, atol=1e-5, rtol=1e-5)
    out_s = binary_op_pallas(x, y, op="sub", force_pallas=True)
    assert jnp.allclose(out_s, x - y, atol=1e-6, rtol=1e-6)
    out_m = binary_op_pallas(x, y, op="mul", force_pallas=True)
    assert jnp.allclose(out_m, x * y, atol=1e-6, rtol=1e-6)

    # Odd shape (total % 128 != 0) exercises the sublane-pad path.
    xo = jax.random.normal(kz, (3, 5, 7), dtype=jnp.float32)
    yo = jax.random.normal(kw, (3, 5, 7), dtype=jnp.float32)
    out_o = binary_op_pallas(xo, yo, op="add", force_pallas=True)
    assert out_o.shape == (3, 5, 7)
    assert jnp.allclose(out_o, xo + yo, atol=1e-6, rtol=1e-6)

    # Broadcasting handled in-kernel (no broadcast_to materialization in HBM).
    yb = jax.random.normal(ky, (1, 4, 1, 16), dtype=jnp.float32)
    out_b = binary_op_pallas(x, yb, op="add", force_pallas=True)
    assert out_b.shape == shape
    assert jnp.allclose(out_b, x + yb, atol=1e-6, rtol=1e-6)

    # Mixed dtype: cast happens on the VPU inside the kernel.
    yh = jax.random.normal(ky, shape, dtype=jnp.bfloat16)
    out_h = binary_op_pallas(x, yh, op="add", force_pallas=True)
    assert out_h.dtype == jnp.float32
    assert jnp.allclose(out_h, x + yh.astype(jnp.float32), atol=1e-2, rtol=1e-2)

    # Larger shape: takes the kernel path without forcing, multi-block
    # "parallel" grid (>= 2 blocks for v7x megacore) with large tiles.
    xl = jax.random.normal(kx, (2, 8, 128, 128), dtype=jnp.float32)
    yl = jax.random.normal(ky, (2, 8, 128, 128), dtype=jnp.float32)
    out_l = binary_op_pallas(xl, yl, op="add")
    jax.block_until_ready(out_l)
    assert jnp.allclose(out_l, xl + yl, atol=1e-6, rtol=1e-6)

    print("KERNEL_OK")
</pallas_src>

<mosaic_0001>
module attributes {stable_mosaic.version = 11 : i64} {
  func.func @_binary_kernel(%arg0: i32, %arg1: memref<8x128xf32, #tpu.memory_space<vmem>>, %arg2: memref<8x128xf32, #tpu.memory_space<vmem>>, %arg3: memref<8x128xf32, #tpu.memory_space<vmem>>) attributes {dimension_semantics = [#tpu.dimension_semantics<parallel>], iteration_bounds = array<i64: 2>, scalar_prefetch = 0 : i64, scratch_operands = 0 : i64, tpu.core_type = #tpu.core_type<tc>, window_params = [{transform_indices = @transform_0, window_bounds = array<i64: 8, 128>}, {transform_indices = @transform_1, window_bounds = array<i64: 8, 128>}, {transform_indices = @transform_2, window_bounds = array<i64: 8, 128>}]} {
    %c0 = arith.constant 0 : index
    %c0_0 = arith.constant 0 : index
    %0 = vector.load %arg1[%c0, %c0_0] : memref<8x128xf32, #tpu.memory_space<vmem>>, vector<8x128xf32>
    %c0_1 = arith.constant 0 : index
    %c0_2 = arith.constant 0 : index
    %1 = vector.load %arg2[%c0_1, %c0_2] : memref<8x128xf32, #tpu.memory_space<vmem>>, vector<8x128xf32>
    %2 = arith.addf %0, %1 : vector<8x128xf32>
    %c0_3 = arith.constant 0 : index
    %c0_4 = arith.constant 0 : index
    %3 = vector.load %arg3[%c0_3, %c0_4] : memref<8x128xf32, #tpu.memory_space<vmem>>, vector<8x128xf32>
    tpu.vector_store %arg3[%c0_3, %c0_4], %2 {strides = array<i32>} : memref<8x128xf32, #tpu.memory_space<vmem>>, vector<8x128xf32>,
    return
  }
  func.func @transform_0(%arg0: i32) -> (i32, i32) {
    %c0_i32 = arith.constant 0 : i32
    %c0_i32_0 = arith.constant 0 : i32
    return %arg0, %c0_i32 : i32, i32
  }
  func.func @transform_1(%arg0: i32) -> (i32, i32) {
    %c0_i32 = arith.constant 0 : i32
    %c0_i32_0 = arith.constant 0 : i32
    return %arg0, %c0_i32 : i32, i32
  }
  func.func @transform_2(%arg0: i32) -> (i32, i32) {
    %c0_i32 = arith.constant 0 : i32
    %c0_i32_0 = arith.constant 0 : i32
    return %arg0, %c0_i32 : i32, i32
  }
}

</mosaic_0001>

<bundles_post_ra>
// kernel: tpu_custom_call.1
= control target key start
LH: loop header
LB: loop body
LE: loop exit
PB: predicated region body
PF: predicated region fallthrough
CT: control target
= control target key end

     0   :  { %7 = vsyncpa [#allocation3], 0  ;;  %s711_s0 = inlined_call_operand.hbm [shape: f32[16,128], index: 0, kind: input, shape index: {}]   ;;  %s712_s1 = inlined_call_operand.hbm [shape: f32[16,128], index: 1, kind: input, shape index: {}]   ;;  %s713_s2 = inlined_call_operand.hbm [shape: f32[16,128], index: 2, kind: output, shape index: {}]  }
   0x1   :  { %9 = vsyncpa [#allocation3 + $0x1], 0 }
   0x2   :  { %10 = vsyncpa [#allocation6], 0 }
   0x3   :  { %12 = vsyncpa [#allocation6 + $0x1], 0 }
   0x4   :  { %13 = vsyncpa [#allocation4], 0 }
   0x5   :  { %15 = vsyncpa [#allocation4 + $0x1], 0  ;;  %s517_s9 = smov 0   ;;  %s519_s10 = smov 0  }
   0x6   :  { %s521_s11 = smov 0   ;;  %s523_s12 = smov 0  }
   0x7 LB: > { %s538_s13 = sadd.s32 4294967295, %s497_s12   ;;  %s307_s14 = sadd.s32 4294967294, %s497_s12   ;;  %s497_s12 = sphi %s523_s12, %s732_s12   ;;  %s493_s11 = sphi %s521_s11, %s731_s11   ;;  %s489_s10 = sphi %s519_s10, %s730_s10   ;;  %s485_s9 = sphi %s517_s9, %s729_s9  }
   0x8   : > { %s542_s15 = sadd.s32 1, %s497_s12   ;;  %s28_s16 = sadd.s32 1, %s493_s11 }
   0x9   : > { %s25_s17 = ssub.s32 %s497_s12, %s542_s15  ;;  %p35_p0 = scmp.ne.s32.totalorder %s493_s11, %s489_s10 }
   0xa   : > { %p26_p1 = scmp.eq.s32.totalorder %s25_s17, 0  ;;  %p36_p2 = scmp.eq.s32.totalorder %s497_s12, 0 }
   0xb   : > { %p41_p3 = scmp.ne.s32.totalorder %s489_s10, %s485_s9  ;;  %p42_p4 = scmp.eq.s32.totalorder %s538_s13, 0 }
   0xc   : > { %s554_s18 = scalar_select %p26_p1, %s493_s11, %s28_s16  }
   0xd   : > { %p556_p5 = por %p36_p2, %p35_p0  ;;  %p560_p6 = por %p42_p4, %p41_p3 }
   0xe   : > { %p91_p7 = scmp.eq.s32.totalorder %s538_s13, 1  ;;  %p97_p8 = scmp.eq.s32.totalorder %s307_s14, 1 }
   0xf   : > { %s717_s20 = scalar_select %p560_p6, 1, 0 }
  0x10   : > { %p339_p10 = scmp.lt.s32.totalorder %s497_s12, 2  ;;  %p567_p11 = por %p91_p7, %p35_p0 }
  0x11   : > { %p571_p12 = por %p97_p8, %p41_p3  ;;  %s576_s23 = sand.u32 1, %s493_s11  }
  0x12   : > { %s718_s21 = scalar_select %p567_p11, 1, 0 }
  0x13   : > { %s719_s22 = scalar_select %p571_p12, 1, 0 }
  0x14   : > { %s311_s24 = sshll.u32 %s497_s12, 7  ;;  %s310_s25 = sshll.u32 %s576_s23, 3 }
  0x15   : > { %s585_s28 = scalar_lea.hbm %s711_s0, %s311_s24  ;;  %s121_s29 = scalar_lea.vmem [#allocation2], %s310_s25 }
  0x16   : > { %s128_s30 = sshll.u32 %s121_s29, 4  ;;  %p591_p13 = pnand %p339_p10, %p556_p5  ;;  %s595_s30 = int_to_ptr.vmem [resolvable:$true] %s128_s30 }
  0x17   : > { %s118_s4 = scalar_lea.sflag [#allocation3], %s576_s23  ;;  %s373_s5 = scalar_lea.hbm %s585_s28, 128 }
  0x18   : > { %p374_p2 = scmp.ne.s32.totalorder %s585_s28, %s373_s5  ;;  %p375_p3 = pneg %p591_p13 }
  0x19   : > { %s378_s8 = scalar_lea.hbm %s711_s0, 256  ;;  %p379_p5 = scmp.lt.s32.totalorder %s585_s28, %s711_s0 }
  0x1a   : > { %p376_p4 = pnand %p375_p3, %p374_p2  ;;  %p380_p8 = scmp.lt.s32.totalorder %s378_s8, %s373_s5 }
  0x1c   : > { %p377_p7 = pneg %p376_p4  ;;  %p381_p10 = por %p380_p8, %p379_p5 }
  0x1e   : > { %p382_p9 = pnand %p381_p10, %p377_p7 }
  0x20   : > { %385 = shalt.err (!%p382_p9)
}
  0x21   : > { %s386_s17 = scalar_lea.vmem %s595_s30, 128  ;;  %s499_s19 = smov [#allocation2]  }
  0x22   : > { %p387_p0 = scmp.ne.s32.totalorder %s595_s30, %s386_s17  ;;  %s391_s26 = sshll.u32 %s499_s19, 4  ;;  %s392_s26 = int_to_ptr.vmem [resolvable:$false] %s391_s26 }
  0x23   : > { %s393_s27 = scalar_lea.vmem %s392_s26, 256  ;;  %p394_p1 = scmp.lt.s32.totalorder %s595_s30, %s392_s26 }
  0x24   : > { %p389_p2 = pnand %p387_p0, %p375_p3  ;;  %p395_p12 = scmp.lt.s32.totalorder %s393_s27, %s386_s17 }
  0x26   : > { %p390_p4 = pneg %p389_p2  ;;  %p396_p11 = por %p395_p12, %p394_p1 }
  0x28   : > { %p397_p5 = pnand %p396_p11, %p390_p4 }
  0x2a   : > { %400 = shalt.err (!%p397_p5)
}
  0x2b   : > { %331 = dma.hbm_to_vmem [thread:$0]  (!%p591_p13), %s585_s28, 128, %s595_s30, %s118_s4  }
  0x2c   : > { %p721_p9 = scmp.lt.s32.totalorder %s497_s12, 3  ;;  %p722_p0 = scmp.ge.s32.totalorder %s497_s12, 1 }
  0x2d   : > { %s637_s7 = scalar_lea.hbm %s712_s1, %s311_s24  ;;  %s139_s8 = scalar_lea.vmem [#allocation5], %s310_s25 }
  0x2e   : > { %p628_p7 = pnand %p722_p0, %p721_p9  ;;  %s146_s14 = sshll.u32 %s139_s8, 4  ;;  %s147_s14 = int_to_ptr.vmem [resolvable:$true] %s146_s14 }
  0x2f   : > { %s136_s28 = scalar_lea.sflag [#allocation6], %s576_s23  ;;  %s401_s30 = scalar_lea.hbm %s637_s7, 128 }
  0x30   : > { %s723_s29 = scalar_select %p628_p7, 1, 0 }
  0x31   : > { %p402_p11 = scmp.ne.s32.totalorder %s637_s7, %s401_s30  ;;  %s406_s17 = scalar_lea.hbm %s712_s1, 256 }
  0x32   : > { %p407_p8 = scmp.lt.s32.totalorder %s637_s7, %s712_s1  ;;  %p408_p10 = scmp.lt.s32.totalorder %s406_s17, %s401_s30 }
  0x33   : > { %p404_p12 = pnand %p402_p11, %p375_p3 }
  0x34   : > { %p409_p2 = por %p408_p10, %p407_p8 }
  0x35   : > { %p405_p1 = pneg %p404_p12 }
  0x37   : > { %p410_p4 = pnand %p409_p2, %p405_p1 }
  0x39   : > { %413 = shalt.err (!%p410_p4)
}
  0x3a   : > { %s414_s25 = scalar_lea.vmem %s147_s14, 128  ;;  %s500_s23 = smov [#allocation5]  }
  0x3b   : > { %p415_p5 = scmp.ne.s32.totalorder %s147_s14, %s414_s25  ;;  %s419_s26 = sshll.u32 %s500_s23, 4  ;;  %s420_s26 = int_to_ptr.vmem [resolvable:$false] %s419_s26 }
  0x3c   : > { %s421_s27 = scalar_lea.vmem %s420_s26, 256  ;;  %p422_p11 = scmp.lt.s32.totalorder %s147_s14, %s420_s26 }
  0x3d   : > { %p417_p9 = pnand %p415_p5, %p375_p3  ;;  %p423_p12 = scmp.lt.s32.totalorder %s421_s27, %s414_s25 }
  0x3f   : > { %p418_p0 = pneg %p417_p9  ;;  %p424_p6 = por %p423_p12, %p422_p11 }
  0x41   : > { %p425_p7 = pnand %p424_p6, %p418_p0 }
  0x43   : > { %428 = shalt.err (!%p425_p7)
}
  0x44   : > { %334 = dma.hbm_to_vmem [thread:$0]  (!%p591_p13), %s637_s7, 128, %s147_s14, %s136_s28  }
  0x45   : > { %p724_p1 = scmp.ne.s32.totalorder %s723_s29, 0 }
  0x46   : > { %s663_s5 = sand.u32 (!%p724_p1), 1, %s489_s10   ;;  %p725_p3 = scmp.ne.s32.totalorder (!%p724_p1), %s717_s20, 0 }
  0x47   : > { %155 = sbr.rel (%p724_p1) target bundleno = 104 (0x68), region = 28  ;;  %s315_s6 = sshll.u32 (!%p724_p1), %s663_s5, 3 }
  0x48   : > { %s158_s8 = scalar_lea.sflag (!%p724_p1), [#allocation3], %s663_s5  ;;  %s161_s30 = scalar_lea.vmem (!%p724_p1), [#allocation2], %s315_s6 }
  0x4c   : > { %472 = dma.done.wait (%p725_p3), %s158_s8, 128  }
  0x4d   : > { %474 = vsyncadd (%p725_p3), %s158_s8, 4294967168  ;;  %s167_s3 = scalar_lea.sflag [#allocation6], %s663_s5  ;;  %s170_s7 = scalar_lea.vmem [#allocation5], %s315_s6 }
  0x4e   : > { %476 = dma.done.wait (%p725_p3), %s167_s3, 128  }
  0x4f   : > { %478 = vsyncadd (%p725_p3), %s167_s3, 4294967168  ;;  %s195_s29 = scalar_lea.vmem [#allocation7], %s315_s6  ;;  %s319_s28 = sshll.u32 %s538_s13, 7  ;;  %v196_v0 = vld [vmem:[%s161_s30] sm:$0xff]  ;;  %v197_v1 = vld [vmem:[%s170_s7] sm:$0xff] }
  0x50   : > { %s214_s14 = sshll.u32 %s195_s29, 4  ;;  %v198_v2 = vadd.f32 %v197_v1, %v196_v0  ;;  %s212_s17 = scalar_lea.hbm %s713_s2, %s319_s28  ;;  %s215_s14 = int_to_ptr.vmem [resolvable:$true] %s214_s14 }
  0x51   : > { %s201_s24 = scalar_lea.sflag [#allocation4], %s663_s5  ;;  %s429_s19 = scalar_lea.vmem %s215_s14, 128 }
  0x52   : > { %199 = vst [vmem:[%s195_s29] sm:$0xff] %v198_v2  ;;  %p430_p6 = scmp.ne.s32.totalorder %s215_s14, %s429_s19  ;;  %p726_p13 = scmp.ne.s32.totalorder %s718_s21, 0 }
  0x53   : > { %s501_s20 = smov [#allocation7]  }
  0x54   : > { %p431_p7 = pnand %p430_p6, %p726_p13  ;;  %s433_s25 = sshll.u32 %s501_s20, 4  ;;  %s434_s25 = int_to_ptr.vmem [resolvable:$false] %s433_s25 }
  0x55   : > { %s435_s23 = scalar_lea.vmem %s434_s25, 256  ;;  %p436_p10 = scmp.lt.s32.totalorder %s215_s14, %s434_s25 }
  0x56   : > { %p432_p8 = pneg %p431_p7  ;;  %p437_p2 = scmp.lt.s32.totalorder %s435_s23, %s429_s19 }
  0x58   : > { %p438_p4 = por %p437_p2, %p436_p10 }
  0x5a   : > { %p439_p5 = pnand %p438_p4, %p432_p8 }
  0x5c   : > { %442 = shalt.err (!%p439_p5)
}
  0x5d   : > { %s443_s13 = scalar_lea.hbm %s212_s17, 128  ;;  %s447_s5 = scalar_lea.hbm %s713_s2, 256 }
  0x5e   : > { %p444_p9 = scmp.ne.s32.totalorder %s212_s17, %s443_s13  ;;  %p448_p12 = scmp.lt.s32.totalorder %s212_s17, %s713_s2 }
  0x5f   : > { %p449_p1 = scmp.lt.s32.totalorder %s447_s5, %s443_s13 }
  0x60   : > { %p445_p0 = pnand %p444_p9, %p726_p13 }
  0x61   : > { %p450_p3 = por %p449_p1, %p448_p12 }
  0x62   : > { %p446_p11 = pneg %p445_p0 }
  0x64   : > { %p451_p6 = pnand %p450_p3, %p446_p11 }
  0x66   : > { %454 = shalt.err (!%p451_p6)
}
  0x67   : > { %326 = dma.vmem_to_hbm [thread:$0]  (%p726_p13), %s215_s14, 128, %s212_s17, %s201_s24  }
  0x68 PF: > { %s226_s30 = sand.u32 1, %s485_s9   ;;  %p727_p7 = scmp.ne.s32.totalorder %s719_s22, 0 }
  0x69   : > { %p728_p8 = scmp.ge.s32.totalorder %s497_s12, 2  ;;  %s227_s3 = scalar_lea.sflag [#allocation4], %s226_s30 }
  0x6b   : > { %p336_p10 = pnand %p728_p8, %p727_p7 }
  0x6d   : > { %p337_p2 = pneg %p336_p10 }
  0x6f   : > { %480 = dma.done.wait (%p337_p2), %s227_s3, 128  }
  0x70   : > { %482 = vsyncadd (%p337_p2), %s227_s3, 4294967168  ;;  %p18_p4 = scmp.ge.s32.totalorder %s542_s15, 4   ;;  %s729_s9 = smov %s489_s10 }
  0x71   : > { %s730_s10 = smov %s493_s11  ;;  %s731_s11 = smov %s554_s18 }
  0x72   : > { %s732_s12 = smov %s542_s15  ;;  %20 = sbr.rel (!%p18_p4) target bundleno = 7 (0x7), region = 86 }
  0x77   :  { %232 = vsyncpa [#allocation3], 1 }
  0x78   :  { %234 = vsyncpa [#allocation3 + $0x1], 1 }
  0x79   :  { %235 = vsyncpa [#allocation6], 1 }
  0x7a   :  { %237 = vsyncpa [#allocation6 + $0x1], 1 }
  0x7b   :  { %238 = vsyncpa [#allocation4], 1 }
  0x7c   :  { %240 = vsyncpa [#allocation4 + $0x1], 1 }

</bundles_post_ra>
